<compile_context>
chip_gen: v7x
topology: tpu7x:2x2x1
jax: 0.10.0
libtpu: 0.0.40
codegen_flags: <defaults>
</compile_context>

<pallas_src>
import math

import jax
import jax.numpy as jnp
from jax.experimental import pallas as pl
from jax.experimental.pallas import tpu as pltpu


def _round_up(a: int, b: int) -> int:
    return -(-a // b) * b


# ---------------------------------------------------------------------------
# Pallas kernel: fused NoisyLinear forward (separable factorized noise)
# ---------------------------------------------------------------------------

def _noisy_linear_kernel(x_ref, w_mu_ref, w_sigma_ref, eps_in_ref, eps_out_ref,
                         b_mu_ref, b_sigma_ref, o_ref):
    # x:             (tm, K)
    # w_mu/w_sigma:  (K, N)    -- stored pre-transposed, natural MXU orientation
    # eps_in:        (1, K)
    # eps_out:       (1, N)
    # b_mu/b_sigma:  (1, N)
    # o:             (tm, N)
    #
    # y = x @ W_mu + ((x * eps_in) @ W_sigma) * eps_out + (b_mu + b_sigma*eps_out)
    # Mathematically identical to x @ (W_mu + W_sigma * outer(eps_in, eps_out)),
    # but never builds a (K, N) temporary in VMEM/vregs.
    x = x_ref[...]
    eps_out = eps_out_ref[...]                                        # (1, N)

    acc = jnp.dot(x, w_mu_ref[...], preferred_element_type=jnp.float32)
    xs = x * eps_in_ref[...]                                          # (tm, K)
    acc += jnp.dot(xs, w_sigma_ref[...],
                   preferred_element_type=jnp.float32) * eps_out
    b = b_mu_ref[...] + b_sigma_ref[...] * eps_out                    # (1, N)
    o_ref[...] = (acc + b).astype(o_ref.dtype)


# ---------------------------------------------------------------------------
# Wrapper: one pallas_call, parallel grid over rows
# ---------------------------------------------------------------------------

def noisy_linear(params, noise, x, *, tm=128):
    """Fused NoisyLinear forward. x: (..., in_features) -> (..., out_features).

    `params` holds pre-transposed weights (K, N) and (1, N) bias rows;
    `noise` holds (1, K)/(1, N) epsilon rows — no per-call layout ops.
    """
    lead = x.shape[:-1]
    K = x.shape[-1]
    N = params["weight_mu_t"].shape[1]
    x2 = x.reshape(-1, K)
    M = x2.shape[0]

    # Tile rows over a parallel grid: shards across both v7x TensorCores and
    # restores pipelining when M is large; small M is a single padded block.
    tile_m = min(tm, _round_up(M, 8))
    m_pad = _round_up(M, tile_m)
    if m_pad != M:
        x2 = jnp.pad(x2, ((0, m_pad - M), (0, 0)))
    grid_m = m_pad // tile_m

    flops = 2 * (2 * m_pad * K * N) + m_pad * K + 3 * m_pad * N
    bytes_accessed = 4 * (m_pad * K + 2 * K * N + K + 3 * N + m_pad * N)

    out = pl.pallas_call(
        _noisy_linear_kernel,
        out_shape=jax.ShapeDtypeStruct((m_pad, N), x.dtype),
        grid_spec=pltpu.PrefetchScalarGridSpec(
            num_scalar_prefetch=0,
            grid=(grid_m,),
            in_specs=[
                pl.BlockSpec((tile_m, K), lambda i: (i, 0)),   # x rows
                pl.BlockSpec((K, N), lambda i: (0, 0)),        # weight_mu (K, N)
                pl.BlockSpec((K, N), lambda i: (0, 0)),        # weight_sigma (K, N)
                pl.BlockSpec((1, K), lambda i: (0, 0)),        # eps_in row
                pl.BlockSpec((1, N), lambda i: (0, 0)),        # eps_out row
                pl.BlockSpec((1, N), lambda i: (0, 0)),        # bias_mu row
                pl.BlockSpec((1, N), lambda i: (0, 0)),        # bias_sigma row
            ],
            out_specs=pl.BlockSpec((tile_m, N), lambda i: (i, 0)),
        ),
        compiler_params=pltpu.CompilerParams(
            dimension_semantics=("parallel",)),
        cost_estimate=pl.CostEstimate(
            flops=flops, transcendentals=0, bytes_accessed=bytes_accessed),
    )(x2, params["weight_mu_t"], params["weight_sigma_t"],
      noise["eps_in_row"], noise["eps_out_row"],
      params["bias_mu_row"], params["bias_sigma_row"])

    if m_pad != M:
        out = out[:M]
    return out.reshape(*lead, N)


# ---------------------------------------------------------------------------
# Parameter / noise construction mirroring the PyTorch module
# (layout hoisted to creation time: kernel-ready shapes, nothing per call)
# ---------------------------------------------------------------------------

def init_params(key, in_features, out_features, std_init=0.5):
    """Matches NoisyLinear.reset_parameters(); weights stored as (K, N)."""
    k_w, k_b = jax.random.split(key)
    mu_range = 1.0 / math.sqrt(in_features)
    return {
        "weight_mu_t": jax.random.uniform(
            k_w, (in_features, out_features), jnp.float32, -mu_range, mu_range),
        "weight_sigma_t": jnp.full(
            (in_features, out_features), std_init / math.sqrt(in_features),
            jnp.float32),
        "bias_mu_row": jax.random.uniform(
            k_b, (1, out_features), jnp.float32, -mu_range, mu_range),
        "bias_sigma_row": jnp.full(
            (1, out_features), std_init / math.sqrt(out_features), jnp.float32),
    }


def _scale_noise(key, size):
    """Factorized gaussian noise: sign(x) * sqrt(|x|), x ~ N(0, 1)."""
    x = jax.random.normal(key, (size,), jnp.float32)
    return jnp.sign(x) * jnp.sqrt(jnp.abs(x))


def reset_noise(key, in_features, out_features):
    """Functional equivalent of NoisyLinear.reset_noise(), kernel-ready 2-D."""
    k_in, k_out = jax.random.split(key)
    return {
        "eps_in_row": _scale_noise(k_in, in_features).reshape(1, in_features),
        "eps_out_row": _scale_noise(k_out, out_features).reshape(1, out_features),
    }
# TODO(synk): reset_noise could be fused into the kernel with pltpu.prng_seed /
# pltpu.prng_random_bits (apply sign(x)*sqrt(|x|) in-kernel) if noise is redrawn
# every step; kept as a separate functional step here.


# ---------------------------------------------------------------------------
# Pure-JAX reference (materialized-W form, matching the PyTorch module)
# ---------------------------------------------------------------------------

def reference(params, noise, x):
    eps_in = noise["eps_in_row"][0]
    eps_out = noise["eps_out_row"][0]
    W_t = params["weight_mu_t"] + params["weight_sigma_t"] * jnp.outer(eps_in, eps_out)
    b = params["bias_mu_row"][0] + params["bias_sigma_row"][0] * eps_out
    return x @ W_t + b


# ---------------------------------------------------------------------------
# Main
# ---------------------------------------------------------------------------

if __name__ == "__main__":
    in_features, out_features = 32, 128   # N=128 -> lane-dense output stores
    batch = 128                           # batch M up front: full MXU row stream

    key = jax.random.PRNGKey(0)
    k_params, k_noise, k_x = jax.random.split(key, 3)

    params = init_params(k_params, in_features, out_features, std_init=0.5)
    noise = reset_noise(k_noise, in_features, out_features)
    x = jax.random.normal(k_x, (batch, in_features), jnp.float32)

    fwd = jax.jit(noisy_linear)
    out = jax.block_until_ready(fwd(params, noise, x))

    ref = reference(params, noise, x)
    assert out.shape == (batch, out_features), out.shape
    assert bool(jnp.all(jnp.isfinite(out)))
    max_err = float(jnp.max(jnp.abs(out - ref)))
    assert bool(jnp.allclose(out, ref, rtol=1e-4, atol=1e-4)), max_err

    print("KERNEL_OK")
</pallas_src>

<mosaic_0001>
module attributes {stable_mosaic.version = 11 : i64} {
  func.func @_noisy_linear_kernel(%arg0: i32, %arg1: memref<128x32xf32, #tpu.memory_space<vmem>>, %arg2: memref<32x128xf32, #tpu.memory_space<vmem>>, %arg3: memref<32x128xf32, #tpu.memory_space<vmem>>, %arg4: memref<1x32xf32, #tpu.memory_space<vmem>>, %arg5: memref<1x128xf32, #tpu.memory_space<vmem>>, %arg6: memref<1x128xf32, #tpu.memory_space<vmem>>, %arg7: memref<1x128xf32, #tpu.memory_space<vmem>>, %arg8: memref<128x128xf32, #tpu.memory_space<vmem>>) attributes {dimension_semantics = [#tpu.dimension_semantics<parallel>], iteration_bounds = array<i64: 1>, scalar_prefetch = 0 : i64, scratch_operands = 0 : i64, tpu.core_type = #tpu.core_type<tc>, window_params = [{transform_indices = @transform_0, window_bounds = array<i64: 128, 32>}, {pipeline_mode = #tpu.pipeline_mode<synchronous>, transform_indices = @transform_1, window_bounds = array<i64: 32, 128>}, {pipeline_mode = #tpu.pipeline_mode<synchronous>, transform_indices = @transform_2, window_bounds = array<i64: 32, 128>}, {pipeline_mode = #tpu.pipeline_mode<synchronous>, transform_indices = @transform_3, window_bounds = array<i64: 1, 32>}, {pipeline_mode = #tpu.pipeline_mode<synchronous>, transform_indices = @transform_4, window_bounds = array<i64: 1, 128>}, {pipeline_mode = #tpu.pipeline_mode<synchronous>, transform_indices = @transform_5, window_bounds = array<i64: 1, 128>}, {pipeline_mode = #tpu.pipeline_mode<synchronous>, transform_indices = @transform_6, window_bounds = array<i64: 1, 128>}, {transform_indices = @transform_7, window_bounds = array<i64: 128, 128>}]} {
    %c0 = arith.constant 0 : index
    %c0_0 = arith.constant 0 : index
    %0 = vector.load %arg1[%c0, %c0_0] : memref<128x32xf32, #tpu.memory_space<vmem>>, vector<128x32xf32>
    %c0_1 = arith.constant 0 : index
    %c0_2 = arith.constant 0 : index
    %1 = vector.load %arg5[%c0_1, %c0_2] : memref<1x128xf32, #tpu.memory_space<vmem>>, vector<1x128xf32>
    %c0_3 = arith.constant 0 : index
    %c0_4 = arith.constant 0 : index
    %2 = vector.load %arg2[%c0_3, %c0_4] : memref<32x128xf32, #tpu.memory_space<vmem>>, vector<32x128xf32>
    %cst = arith.constant dense<0.000000e+00> : vector<128x128xf32>
    %3 = tpu.matmul %0, %2, %cst {dimension_numbers = #tpu.dot_dimension_numbers<[1], [0], [0], [1], [0, 0, 1, 1], [], []>} : vector<128x32xf32>, vector<32x128xf32>, vector<128x128xf32> -> vector<128x128xf32>
    %c0_5 = arith.constant 0 : index
    %c0_6 = arith.constant 0 : index
    %4 = vector.load %arg4[%c0_5, %c0_6] : memref<1x32xf32, #tpu.memory_space<vmem>>, vector<1x32xf32>
    %5 = vector.broadcast %4 : vector<1x32xf32> to vector<128x32xf32>
    %6 = arith.mulf %0, %5 : vector<128x32xf32>
    %c0_7 = arith.constant 0 : index
    %c0_8 = arith.constant 0 : index
    %7 = vector.load %arg3[%c0_7, %c0_8] : memref<32x128xf32, #tpu.memory_space<vmem>>, vector<32x128xf32>
    %cst_9 = arith.constant dense<0.000000e+00> : vector<128x128xf32>
    %8 = tpu.matmul %6, %7, %cst_9 {dimension_numbers = #tpu.dot_dimension_numbers<[1], [0], [0], [1], [0, 0, 1, 1], [], []>} : vector<128x32xf32>, vector<32x128xf32>, vector<128x128xf32> -> vector<128x128xf32>
    %9 = vector.broadcast %1 : vector<1x128xf32> to vector<128x128xf32>
    %10 = arith.mulf %8, %9 : vector<128x128xf32>
    %11 = arith.addf %3, %10 : vector<128x128xf32>
    %c0_10 = arith.constant 0 : index
    %c0_11 = arith.constant 0 : index
    %12 = vector.load %arg6[%c0_10, %c0_11] : memref<1x128xf32, #tpu.memory_space<vmem>>, vector<1x128xf32>
    %c0_12 = arith.constant 0 : index
    %c0_13 = arith.constant 0 : index
    %13 = vector.load %arg7[%c0_12, %c0_13] : memref<1x128xf32, #tpu.memory_space<vmem>>, vector<1x128xf32>
    %14 = arith.mulf %13, %1 : vector<1x128xf32>
    %15 = arith.addf %12, %14 : vector<1x128xf32>
    %16 = vector.broadcast %15 : vector<1x128xf32> to vector<128x128xf32>
    %17 = arith.addf %11, %16 : vector<128x128xf32>
    %c0_14 = arith.constant 0 : index
    %c0_15 = arith.constant 0 : index
    %18 = vector.load %arg8[%c0_14, %c0_15] : memref<128x128xf32, #tpu.memory_space<vmem>>, vector<128x128xf32>
    tpu.vector_store %arg8[%c0_14, %c0_15], %17 {strides = array<i32>} : memref<128x128xf32, #tpu.memory_space<vmem>>, vector<128x128xf32>,
    return
  }
  func.func @transform_0(%arg0: i32) -> (i32, i32) {
    %c0_i32 = arith.constant 0 : i32
    %c0_i32_0 = arith.constant 0 : i32
    return %arg0, %c0_i32 : i32, i32
  }
  func.func @transform_1(%arg0: i32) -> (i32, i32) {
    %c0_i32 = arith.constant 0 : i32
    %c0_i32_0 = arith.constant 0 : i32
    %c0_i32_1 = arith.constant 0 : i32
    return %c0_i32, %c0_i32_0 : i32, i32
  }
  func.func @transform_2(%arg0: i32) -> (i32, i32) {
    %c0_i32 = arith.constant 0 : i32
    %c0_i32_0 = arith.constant 0 : i32
    %c0_i32_1 = arith.constant 0 : i32
    return %c0_i32, %c0_i32_0 : i32, i32
  }
  func.func @transform_3(%arg0: i32) -> (i32, i32) {
    %c0_i32 = arith.constant 0 : i32
    %c0_i32_0 = arith.constant 0 : i32
    %c0_i32_1 = arith.constant 0 : i32
    return %c0_i32, %c0_i32_0 : i32, i32
  }
  func.func @transform_4(%arg0: i32) -> (i32, i32) {
    %c0_i32 = arith.constant 0 : i32
    %c0_i32_0 = arith.constant 0 : i32
    %c0_i32_1 = arith.constant 0 : i32
    return %c0_i32, %c0_i32_0 : i32, i32
  }
  func.func @transform_5(%arg0: i32) -> (i32, i32) {
    %c0_i32 = arith.constant 0 : i32
    %c0_i32_0 = arith.constant 0 : i32
    %c0_i32_1 = arith.constant 0 : i32
    return %c0_i32, %c0_i32_0 : i32, i32
  }
  func.func @transform_6(%arg0: i32) -> (i32, i32) {
    %c0_i32 = arith.constant 0 : i32
    %c0_i32_0 = arith.constant 0 : i32
    %c0_i32_1 = arith.constant 0 : i32
    return %c0_i32, %c0_i32_0 : i32, i32
  }
  func.func @transform_7(%arg0: i32) -> (i32, i32) {
    %c0_i32 = arith.constant 0 : i32
    %c0_i32_0 = arith.constant 0 : i32
    return %arg0, %c0_i32 : i32, i32
  }
}

</mosaic_0001>

<bundles_post_ra>
// kernel: noisy_linear.1
= control target key start
LH: loop header
LB: loop body
LE: loop exit
PB: predicated region body
PF: predicated region fallthrough
CT: control target
= control target key end

     0   :  { %vm75_vm0 = vcmask 261120   ;;  %s947_s0 = inlined_call_operand.vmem [shape: f32[128,32], index: 0, kind: input, shape index: {}]   ;;  %s948_s1 = inlined_call_operand.vmem [shape: f32[32,128], index: 1, kind: input, shape index: {}]   ;;  %s949_s2 = inlined_call_operand.vmem [shape: f32[32,128], index: 2, kind: input, shape index: {}]   ;;  %s950_s3 = inlined_call_operand.vmem [shape: f32[1,32], index: 3, kind: input, shape index: {}]   ;;  %s951_s4 = inlined_call_operand.vmem [shape: f32[1,128], index: 4, kind: input, shape index: {}]   ;;  %s952_s5 = inlined_call_operand.vmem [shape: f32[1,128], index: 5, kind: input, shape index: {}]   ;;  %s953_s6 = inlined_call_operand.vmem [shape: f32[1,128], index: 6, kind: input, shape index: {}]   ;;  %s954_s7 = inlined_call_operand.hbm [shape: f32[128,128], index: 7, kind: output, shape index: {}]  }
   0x1   :  { %v71_v0 = vld [vmem:[%s949_s2] sm:$0xff]  ;;  %v72_v1 = vld [vmem:[%s949_s2 + $0x8] sm:$0xff]  ;;  %v73_v5 = vld [vmem:[%s949_s2 + $0x10] sm:$0xff] }
   0x2   :  { %v44_v2 = vld [vmem:[%s948_s1] sm:$0xff]  ;;  %v679_v3 = vpack.c.bf16 %v72_v1, %v71_v0  ;;  %v45_v4 = vld [vmem:[%s948_s1 + $0x8] sm:$0xff]  ;;  %v74_v6 = vld [vmem:[%s949_s2 + $0x18] sm:$0xff] }
   0x3   :  { %v687_v7 = vpack.c.bf16 %v45_v4, %v44_v2  ;;  %v683_v8 = vpack.c.bf16 %v74_v6, %v73_v5  ;;  %v46_v9 = vld [vmem:[%s948_s1 + $0x10] sm:$0xff]  ;;  %v47_v10 = vld [vmem:[%s948_s1 + $0x18] sm:$0xff]  ;;  %v27_v11 = vld [vmem:[%s947_s0] sm:$0xff] }
   0x4   :  { %680 = vmatprep.subr.bf16.mxu0 %v679_v3  ;;  %v691_v12 = vpack.c.bf16 %v47_v10, %v46_v9  ;;  %v795_v13 = vld [vmem:[%s950_s3] ss:$0 sm:$0xff]  ;;  %655 = vmatprep.mubr.msk.f32.mxu1 %vm75_vm0, %v27_v11  ;;  %v28_v15 = vld [vmem:[%s947_s0 + $0x8] sm:$0xff]  ;;  %v29_v16 = vld [vmem:[%s947_s0 + $0x10] sm:$0xff] }
   0x5   :  { %682 = vmatpush3.bf16.msra.mxu0 %v679_v3  ;;  %688 = vmatprep.subr.bf16.mxu1 %v687_v7  ;;  %v55_v14 = vmul.f32 %v795_v13, %v27_v11  ;;  %v56_v17 = vmul.f32 %v795_v13, %v28_v15  ;;  %v57_v18 = vmul.f32 %v795_v13, %v29_v16  ;;  %v30_v19 = vld [vmem:[%s947_s0 + $0x18] sm:$0xff] }
   0x6   :  { %690 = vmatpush3.bf16.msra.mxu1 %v687_v7  ;;  %684 = vmatprep.subr.bf16.mxu0 %v683_v8 }
   0x7   :  { %692 = vmatprep.subr.bf16.mxu1 %v691_v12  ;;  %623 = vmatprep.mubr.msk.f32.mxu0 %vm75_vm0, %v55_v14 }
   0x9   :  { %686 = vmatpush3.bf16.msra.mxu0 %v683_v8 }
   0xa   :  { %12 = vsyncpa [#allocation3], 0  ;;  %694 = vmatpush3.bf16.msra.mxu1 %v691_v12  ;;  %v31_v20 = vld [vmem:[%s947_s0 + $0x20] sm:$0xff]  ;;  %v58_v21 = vmul.f32 %v795_v13, %v30_v19  ;;  %v32_v23 = vld [vmem:[%s947_s0 + $0x28] sm:$0xff]  ;;  %v270_v45 = vlaneseq }
   0xb   :  { %v59_v22 = vmul.f32 %v795_v13, %v31_v20  ;;  %v33_v24 = vld [vmem:[%s947_s0 + $0x30] sm:$0xff]  ;;  %v60_v25 = vmul.f32 %v795_v13, %v32_v23  ;;  %v34_v27 = vld [vmem:[%s947_s0 + $0x38] sm:$0xff]  ;;  %v35_v28 = vld [vmem:[%s947_s0 + $0x40] sm:$0xff] }
   0xc   :  { %624 = vmatmul.mubr.msk.f32.vlgmr.msra.gmra.mrb[0].mxu0 %vm75_vm0, %v56_v17  ;;  %v61_v26 = vmul.f32 %v795_v13, %v33_v24  ;;  %v62_v29 = vmul.f32 %v795_v13, %v34_v27  ;;  %v63_v30 = vmul.f32 %v795_v13, %v35_v28  ;;  %v36_v31 = vld [vmem:[%s947_s0 + $0x48] sm:$0xff]  ;;  %v37_v32 = vld [vmem:[%s947_s0 + $0x50] sm:$0xff]  ;;  %v38_v35 = vld [vmem:[%s947_s0 + $0x58] sm:$0xff]  ;;  %v271_v46 = vshrl.u32 %v270_v45, 7 }
   0xd   :  { %656 = vmatmul.mubr.msk.f32.vlgmr.msra.gmra.mrb[0].mxu1 %vm75_vm0, %v28_v15  ;;  %626 = vmatprep.mubr.msk.f32.mxu0 %vm75_vm0, %v57_v18  ;;  %v64_v33 = vmul.f32 %v795_v13, %v36_v31  ;;  %v65_v34 = vmul.f32 %v795_v13, %v37_v32  ;;  %v39_v36 = vld [vmem:[%s947_s0 + $0x60] sm:$0xff]  ;;  %v66_v37 = vmul.f32 %v795_v13, %v38_v35  ;;  %v40_v39 = vld [vmem:[%s947_s0 + $0x68] sm:$0xff]  ;;  %v41_v40 = vld [vmem:[%s947_s0 + $0x70] sm:$0xff] }
   0xe   :  { %658 = vmatprep.mubr.msk.f32.mxu1 %vm75_vm0, %v29_v16  ;;  %v67_v38 = vmul.f32 %v795_v13, %v39_v36  ;;  %v68_v41 = vmul.f32 %v795_v13, %v40_v39  ;;  %v69_v42 = vmul.f32 %v795_v13, %v41_v40  ;;  %v42_v43 = vld [vmem:[%s947_s0 + $0x78] sm:$0xff]  ;;  %v43_v47 = vld [vmem:[%s951_s4] sm:$0x1]  ;;  %v272_v49 = vsub.s32 0, %v271_v46  ;;  %s722_s4 = smov [#allocation2]  }
   0xf   :  { %v70_v44 = vmul.f32 %v795_v13, %v42_v43  ;;  %v485_v48 = vld [vmem:[%s953_s6] sm:$0x1] }
  0x10   :  { %627 = vmatmul.mubr.msk.f32.gmra.mrb[2].mxu0 %vm75_vm0, %v58_v21  ;;  %v486_v50 = vmul.f32 %v485_v48, %v43_v47  ;;  %v484_v51 = vld [vmem:[%s952_s5] sm:$0x1]  ;;  %v899_v52 = vrot.slane %v43_v47, %v272_v49  ;;  %s531_s5 = sshll.u32 %s722_s4, 4  ;;  %s532_s5 = int_to_ptr.vmem [resolvable:$true] %s531_s5 }
  0x11   :  { %659 = vmatmul.mubr.msk.f32.gmra.mrb[2].mxu1 %vm75_vm0, %v30_v19  ;;  %629 = vmatprep.mubr.msk.f32.mxu0 %vm75_vm0, %v59_v22  ;;  %s698_s6 = scalar_lea.vmem %s532_s5, 2048  ;;  %p703_p1 = scmp.lt.s32.totalorder %s532_s5, %s532_s5 }
  0x12   :  { %661 = vmatprep.mubr.msk.f32.mxu1 %vm75_vm0, %v31_v20  ;;  %v487_v53 = vadd.f32 %v486_v50, %v484_v51  ;;  %p699_p0 = scmp.ne.s32.totalorder %s532_s5, %s698_s6  ;;  %p704_p2 = scmp.lt.s32.totalorder %s698_s6, %s698_s6 }
  0x14   :  { %630 = vmatmul.mubr.msk.f32.gmra.mrb[4].mxu0 %vm75_vm0, %v60_v25  ;;  %v902_v58 = vrot.slane %v487_v53, %v272_v49  ;;  %p705_p3 = por %p704_p2, %p703_p1 }
  0x15   :  { %662 = vmatmul.mubr.msk.f32.gmra.mrb[4].mxu1 %vm75_vm0, %v32_v23  ;;  %632 = vmatprep.mubr.msk.f32.mxu0 %vm75_vm0, %v61_v26 }
  0x16   :  { %664 = vmatprep.mubr.msk.f32.mxu1 %vm75_vm0, %v33_v24  ;;  %p706_p4 = pnand %p705_p3, %p699_p0 }
  0x18   :  { %633 = vmatmul.mubr.msk.f32.gmra.mrb[6].mxu0 %vm75_vm0, %v62_v29 }
  0x19   :  { %665 = vmatmul.mubr.msk.f32.gmra.mrb[6].mxu1 %vm75_vm0, %v34_v27  ;;  %635 = vmatprep.mubr.msk.f32.mxu0 %vm75_vm0, %v63_v30 }
  0x1a   :  { %667 = vmatprep.mubr.msk.f32.mxu1 %vm75_vm0, %v35_v28 }
  0x1c   :  { %636 = vmatmul.mubr.msk.f32.gmra.mrb[8].mxu0 %vm75_vm0, %v64_v33 }
  0x1d   :  { %668 = vmatmul.mubr.msk.f32.gmra.mrb[8].mxu1 %vm75_vm0, %v36_v31  ;;  %638 = vmatprep.mubr.msk.f32.mxu0 %vm75_vm0, %v65_v34 }
  0x1e   :  { %670 = vmatprep.mubr.msk.f32.mxu1 %vm75_vm0, %v37_v32 }
  0x20   :  { %639 = vmatmul.mubr.msk.f32.gmra.mrb[10].mxu0 %vm75_vm0, %v66_v37 }
  0x21   :  { %671 = vmatmul.mubr.msk.f32.gmra.mrb[10].mxu1 %vm75_vm0, %v38_v35  ;;  %641 = vmatprep.mubr.msk.f32.mxu0 %vm75_vm0, %v67_v38 }
  0x22   :  { %673 = vmatprep.mubr.msk.f32.mxu1 %vm75_vm0, %v39_v36 }
  0x24   :  { %642 = vmatmul.mubr.msk.f32.gmra.mrb[12].mxu0 %vm75_vm0, %v68_v41 }
  0x25   :  { %674 = vmatmul.mubr.msk.f32.gmra.mrb[12].mxu1 %vm75_vm0, %v40_v39  ;;  %644 = vmatprep.mubr.msk.f32.mxu0 %vm75_vm0, %v69_v42 }
  0x26   :  { %676 = vmatprep.mubr.msk.f32.mxu1 %vm75_vm0, %v41_v40 }
  0x28   :  { %645 = vmatmul.mubr.msk.f32.gmra.mrb[14].mxu0 %vm75_vm0, %v70_v44 }
  0x29   :  { %677 = vmatmul.mubr.msk.f32.gmra.mrb[14].mxu1 %vm75_vm0, %v42_v43 }
  0xdf   :  { %v625_v54 = vpop.f32.mrb[0].mxu0 }
  0xe0   :  { %v276_v55 = vmul.f32 %v625_v54, %v899_v52  ;;  %v190_v56 = vpop.f32.mrb[1].mxu0  ;;  %v657_v57 = vpop.f32.mrb[0].mxu1 }
  0xe1   :  { %v275_v59 = vmul.f32 %v899_v52, %v190_v56  ;;  %v405_v60 = vpop.f32.mrb[1].mxu1 }
  0xe2   :  { %v411_v61 = vadd.f32 %v657_v57, %v276_v55 }
  0xe3   :  { %v406_v62 = vadd.f32 %v405_v60, %v275_v59  ;;  %v628_v63 = vpop.f32.mrb[2].mxu0 }
  0xe4   :  { %v495_v0 = vadd.f32 %v902_v58, %v411_v61  ;;  %v278_v1 = vmul.f32 %v628_v63, %v899_v52  ;;  %v200_v2 = vpop.f32.mrb[3].mxu0  ;;  %v660_v3 = vpop.f32.mrb[2].mxu1 }
  0xe5   :  { %v494_v4 = vadd.f32 %v902_v58, %v406_v62  ;;  %v277_v5 = vmul.f32 %v899_v52, %v200_v2  ;;  %v415_v6 = vpop.f32.mrb[3].mxu1 }
  0xe6   :  { %511 = vst [vmem:[#allocation2 + $0x8] sm:$0xff] %v495_v0  ;;  %v421_v7 = vadd.f32 %v660_v3, %v278_v1 }
  0xe7   :  { %510 = vst [vmem:[#allocation2] sm:$0xff] %v494_v4  ;;  %v416_v8 = vadd.f32 %v415_v6, %v277_v5  ;;  %v631_v9 = vpop.f32.mrb[4].mxu0 }
  0xe8   :  { %v497_v10 = vadd.f32 %v902_v58, %v421_v7  ;;  %v280_v11 = vmul.f32 %v631_v9, %v899_v52  ;;  %v210_v12 = vpop.f32.mrb[5].mxu0  ;;  %v663_v13 = vpop.f32.mrb[4].mxu1 }
  0xe9   :  { %v496_v14 = vadd.f32 %v902_v58, %v416_v8  ;;  %v279_v15 = vmul.f32 %v899_v52, %v210_v12  ;;  %v425_v16 = vpop.f32.mrb[5].mxu1 }
  0xea   :  { %513 = vst [vmem:[#allocation2 + $0x18] sm:$0xff] %v497_v10  ;;  %v431_v17 = vadd.f32 %v663_v13, %v280_v11 }
  0xeb   :  { %512 = vst [vmem:[#allocation2 + $0x10] sm:$0xff] %v496_v14  ;;  %v426_v18 = vadd.f32 %v425_v16, %v279_v15  ;;  %v634_v19 = vpop.f32.mrb[6].mxu0 }
  0xec   :  { %v499_v20 = vadd.f32 %v902_v58, %v431_v17  ;;  %v282_v21 = vmul.f32 %v634_v19, %v899_v52  ;;  %v220_v22 = vpop.f32.mrb[7].mxu0  ;;  %v666_v23 = vpop.f32.mrb[6].mxu1 }
  0xed   :  { %v498_v24 = vadd.f32 %v902_v58, %v426_v18  ;;  %v281_v25 = vmul.f32 %v899_v52, %v220_v22  ;;  %v435_v26 = vpop.f32.mrb[7].mxu1 }
  0xee   :  { %515 = vst [vmem:[#allocation2 + $0x28] sm:$0xff] %v499_v20  ;;  %v441_v27 = vadd.f32 %v666_v23, %v282_v21 }
  0xef   :  { %514 = vst [vmem:[#allocation2 + $0x20] sm:$0xff] %v498_v24  ;;  %v436_v28 = vadd.f32 %v435_v26, %v281_v25  ;;  %v637_v29 = vpop.f32.mrb[8].mxu0 }
  0xf0   :  { %v501_v30 = vadd.f32 %v902_v58, %v441_v27  ;;  %v284_v31 = vmul.f32 %v637_v29, %v899_v52  ;;  %v230_v32 = vpop.f32.mrb[9].mxu0  ;;  %v669_v33 = vpop.f32.mrb[8].mxu1 }
  0xf1   :  { %v500_v34 = vadd.f32 %v902_v58, %v436_v28  ;;  %v283_v35 = vmul.f32 %v899_v52, %v230_v32  ;;  %v445_v36 = vpop.f32.mrb[9].mxu1 }
  0xf2   :  { %517 = vst [vmem:[#allocation2 + $0x38] sm:$0xff] %v501_v30  ;;  %v451_v37 = vadd.f32 %v669_v33, %v284_v31 }
  0xf3   :  { %516 = vst [vmem:[#allocation2 + $0x30] sm:$0xff] %v500_v34  ;;  %v446_v38 = vadd.f32 %v445_v36, %v283_v35  ;;  %v640_v39 = vpop.f32.mrb[10].mxu0 }
  0xf4   :  { %v503_v40 = vadd.f32 %v902_v58, %v451_v37  ;;  %v286_v41 = vmul.f32 %v640_v39, %v899_v52  ;;  %v240_v42 = vpop.f32.mrb[11].mxu0  ;;  %v672_v43 = vpop.f32.mrb[10].mxu1 }
  0xf5   :  { %v502_v44 = vadd.f32 %v902_v58, %v446_v38  ;;  %v285_v45 = vmul.f32 %v899_v52, %v240_v42  ;;  %v455_v46 = vpop.f32.mrb[11].mxu1 }
  0xf6   :  { %519 = vst [vmem:[#allocation2 + $0x48] sm:$0xff] %v503_v40  ;;  %v461_v47 = vadd.f32 %v672_v43, %v286_v41 }
  0xf7   :  { %518 = vst [vmem:[#allocation2 + $0x40] sm:$0xff] %v502_v44  ;;  %v456_v48 = vadd.f32 %v455_v46, %v285_v45  ;;  %v643_v49 = vpop.f32.mrb[12].mxu0 }
  0xf8   :  { %v505_v50 = vadd.f32 %v902_v58, %v461_v47  ;;  %v288_v51 = vmul.f32 %v643_v49, %v899_v52  ;;  %v250_v53 = vpop.f32.mrb[13].mxu0  ;;  %v675_v54 = vpop.f32.mrb[12].mxu1 }
  0xf9   :  { %v504_v55 = vadd.f32 %v902_v58, %v456_v48  ;;  %v287_v56 = vmul.f32 %v899_v52, %v250_v53  ;;  %v465_v57 = vpop.f32.mrb[13].mxu1 }
  0xfa   :  { %521 = vst [vmem:[#allocation2 + $0x58] sm:$0xff] %v505_v50  ;;  %v471_v59 = vadd.f32 %v675_v54, %v288_v51 }
  0xfb   :  { %520 = vst [vmem:[#allocation2 + $0x50] sm:$0xff] %v504_v55  ;;  %v466_v60 = vadd.f32 %v465_v57, %v287_v56  ;;  %v646_v61 = vpop.f32.mrb[14].mxu0 }
  0xfc   :  { %v507_v62 = vadd.f32 %v902_v58, %v471_v59  ;;  %v290_v63 = vmul.f32 %v646_v61, %v899_v52  ;;  %v260_v0 = vpop.f32.mrb[15].mxu0  ;;  %v678_v1 = vpop.f32.mrb[14].mxu1 }
  0xfd   :  { %v506_v2 = vadd.f32 %v902_v58, %v466_v60  ;;  %v289_v3 = vmul.f32 %v899_v52, %v260_v0  ;;  %v475_v4 = vpop.f32.mrb[15].mxu1 }
  0xfe   :  { %523 = vst [vmem:[#allocation2 + $0x68] sm:$0xff] %v507_v62  ;;  %v481_v5 = vadd.f32 %v678_v1, %v290_v63 }
  0xff   :  { %522 = vst [vmem:[#allocation2 + $0x60] sm:$0xff] %v506_v2  ;;  %v476_v6 = vadd.f32 %v475_v4, %v289_v3 }
 0x100   :  { %v509_v7 = vadd.f32 %v902_v58, %v481_v5 }
 0x101   :  { %v508_v8 = vadd.f32 %v902_v58, %v476_v6 }
 0x102   :  { %525 = vst [vmem:[#allocation2 + $0x78] sm:$0xff] %v509_v7 }
 0x103   :  { %524 = vst [vmem:[#allocation2 + $0x70] sm:$0xff] %v508_v8 }
 0x104   :  { %709 = shalt.err (!%p706_p4)
}
 0x105   :  { %s710_s29 = scalar_lea.hbm %s954_s7, 2048 }
 0x106   :  { %p711_p5 = scmp.ne.s32.totalorder %s954_s7, %s710_s29  ;;  %p714_p6 = scmp.lt.u32.totalorder %s710_s29, %s954_s7 }
 0x108   :  { %p716_p7 = pnand %p714_p6, %p711_p5 }
 0x10a   :  { %719 = shalt.err (!%p716_p7)
}
 0x10b   :  { %s723_s11 = smov 128   ;;  %s724_s12 = smov 8  }
 0x10c   :  { %537 = dma.vmem_to_hbm [thread:$0]  %s532_s5, 2048, %s954_s7, [#allocation3], %s723_s11, %s723_s11, %s724_s12  }
 0x10d   :  { %720 = dma.done.wait [#allocation3], 2048  }
 0x10e   :  { %721 = vsyncadd [#allocation3], 4294965248 }
 0x10f   :  { %541 = vsyncpa [#allocation3], 1 }

</bundles_post_ra>
